<compile_context>
chip_gen: v5e
topology: v5e:2x2
jax: 0.10.0
libtpu: 0.0.40
codegen_flags: <defaults>
</compile_context>

<pallas_src>
import jax
import jax.numpy as jnp
from jax.experimental import pallas as pl
from jax.experimental.pallas import tpu as pltpu


# ---------------------------------------------------------------------------
# Kernels
# ---------------------------------------------------------------------------

def _lgconv_single_block_kernel(a_ref, x_ref, o_ref):
    """Whole problem resident in VMEM: a single MXU pass, no grid."""
    o_ref[...] = jnp.dot(
        a_ref[...], x_ref[...], preferred_element_type=jnp.float32
    ).astype(o_ref.dtype)


def _lgconv_tiled_kernel_f32out(a_ref, x_ref, o_ref):
    """Tiled matmul; accumulate directly into the resident f32 output tile."""
    @pl.when(pl.program_id(2) == 0)
    def _():
        o_ref[...] = jnp.zeros_like(o_ref)

    o_ref[...] += jnp.dot(
        a_ref[...], x_ref[...], preferred_element_type=jnp.float32
    )


def _lgconv_tiled_kernel_acc(a_ref, x_ref, o_ref, acc_ref):
    """Tiled matmul with f32 accumulator scratch (for non-f32 outputs)."""
    @pl.when(pl.program_id(2) == 0)
    def _():
        acc_ref[...] = jnp.zeros_like(acc_ref)

    acc_ref[...] += jnp.dot(
        a_ref[...], x_ref[...], preferred_element_type=jnp.float32
    )

    @pl.when(pl.program_id(2) == pl.num_programs(2) - 1)
    def _():
        o_ref[...] = acc_ref[...].astype(o_ref.dtype)


# ---------------------------------------------------------------------------
# Hardware / tiling helpers
# ---------------------------------------------------------------------------

def _round_up(v, m):
    return (v + m - 1) // m * m


def _tpu_generation_and_vmem():
    """Best-effort (generation, scoped_vmem_default, physical_vmem)."""
    gen, scoped, phys = 6, 32 << 20, 128 << 20
    try:
        kind = jax.devices()[0].device_kind.lower()
    except Exception:
        kind = ""
    if "v5" in kind:
        gen, scoped, phys = 5, 16 << 20, 128 << 20
    elif "v6" in kind:
        gen, scoped, phys = 6, 32 << 20, 128 << 20
    elif "v7" in kind:
        gen, scoped, phys = 7, 32 << 20, 64 << 20
    try:
        phys = int(pltpu.get_tpu_info().vmem_capacity_bytes)
    except Exception:
        pass
    return gen, scoped, phys


def _pick_tile(n128, cap):
    """Largest tile (multiple of 128, <= cap) with <=10% padding waste.

    `n128` must already be a multiple of 128; returns (tile, padded_dim)."""
    for t in (1024, 512, 256, 128):
        if t > cap:
            continue
        padded = _round_up(n128, t)
        if padded * 10 <= n128 * 11:           # <= 10% waste along this dim
            return t, padded
    return 128, n128


def _pick_tn(Dp, wide_mxu):
    """Output-tile width: divisor of Dp, lane-dense, 256+ on 2x256 MXUs."""
    cands = (512, 256, 128) if wide_mxu else (256, 128)
    for c in cands:
        if Dp % c == 0:
            return c
    return 128


def _adj_block_spec(tm, tk):
    """Adjacency tile spec with 3-deep pipelining when supported."""
    idx = lambda i, j, k: (i, k)
    try:
        return pl.BlockSpec((tm, tk), idx, pipeline_mode=pl.Buffered(3))
    except (TypeError, AttributeError):
        return pl.BlockSpec((tm, tk), idx)


# ---------------------------------------------------------------------------
# ODEFunction
# ---------------------------------------------------------------------------

class ODEFunctionPallas:
    """Pallas port of LT-OCF's ODEFunction: forward(t, x) = adj_t @ x.

    The adjacency is cast (and, on the tiled path, padded) ONCE at
    construction and reused for every ODE-solver call.
    """

    def __init__(self, adj, feature_dim, *, compute_dtype=jnp.bfloat16,
                 out_dtype=jnp.float32, force_tiled=False):
        N, K = adj.shape
        assert N == K, "normalized adjacency must be square"
        D = int(feature_dim)
        self._N, self._K, self._D = N, K, D

        compute_dtype = jnp.dtype(compute_dtype)
        out_dtype = jnp.dtype(out_dtype)
        cd = compute_dtype.itemsize
        od = out_dtype.itemsize

        gen, vmem_scoped, vmem_phys = _tpu_generation_and_vmem()
        single_block_budget = (3 * vmem_scoped) // 4    # 12 MiB v5e, 24 MiB v6e/v7x

        # VMEM footprint of the gridless path (Mosaic pads to (8,128) tiles).
        ru = _round_up
        single_bytes = (ru(N, 8) * ru(K, 128) * cd
                        + ru(K, 8) * ru(D, 128) * cd
                        + ru(N, 8) * ru(D, 128) * max(od, 4))

        if single_bytes <= single_block_budget and not force_tiled:
            # ---- small path: one gridless launch, full-array VMEM blocks ----
            cost = pl.CostEstimate(
                flops=2 * N * K * D,
                transcendentals=0,
                bytes_accessed=N * K * cd + K * D * cd + N * D * od,
            )
            call = pl.pallas_call(
                _lgconv_single_block_kernel,
                out_shape=jax.ShapeDtypeStruct((N, D), out_dtype),
                in_specs=[
                    pl.BlockSpec(memory_space=pltpu.MemorySpace.VMEM),
                    pl.BlockSpec(memory_space=pltpu.MemorySpace.VMEM),
                ],
                out_specs=pl.BlockSpec(memory_space=pltpu.MemorySpace.VMEM),
                cost_estimate=cost,
            )
            self._adj_prepared = jnp.asarray(adj, compute_dtype)   # cached

            def fwd(a_p, x):
                return call(a_p, x.astype(compute_dtype))

            self._forward = jax.jit(fwd)
            return

        # ---- large path: tiled matmul, reduction axis last ----
        N128, K128, Dp = ru(N, 128), ru(K, 128), ru(D, 128)
        tile_cap = 1024 if (gen >= 7 and cd <= 2) else 512
        tm, Np = _pick_tile(N128, tile_cap)
        tk, Kp = _pick_tile(K128, tile_cap)
        tn = _pick_tn(Dp, wide_mxu=(gen >= 6))

        # v7x has 2 TensorCores: make sure the parallel i axis has >=2 blocks.
        if gen >= 7 and (Dp // tn) == 1:
            while (Np // tm) < 2 and tm > 128:
                tm //= 2

        grid = (Np // tm, Dp // tn, Kp // tk)

        if out_dtype == jnp.float32:
            kernel = _lgconv_tiled_kernel_f32out
            scratch_shapes = []                       # accumulate into o_ref
            acc_bytes = 0
        else:
            kernel = _lgconv_tiled_kernel_acc
            scratch_shapes = [pltpu.VMEM((tm, tn), jnp.float32)]
            acc_bytes = tm * tn * 4

        est_vmem = (3 * tm * tk * cd            # adjacency, Buffered(3)
                    + 2 * tk * tn * cd          # x, double buffered
                    + 2 * tm * tn * od          # output, double buffered
                    + acc_bytes)
        vmem_limit = int(min(max(2 * est_vmem + (2 << 20), vmem_scoped),
                             max(vmem_phys - (8 << 20), vmem_scoped)))

        cost = pl.CostEstimate(
            flops=2 * Np * Kp * Dp,
            transcendentals=0,
            bytes_accessed=(Np * Kp * cd * (Dp // tn)
                            + Kp * Dp * cd * (Np // tm)
                            + Np * Dp * od),
        )

        call = pl.pallas_call(
            kernel,
            out_shape=jax.ShapeDtypeStruct((Np, Dp), out_dtype),
            grid_spec=pltpu.PrefetchScalarGridSpec(
                num_scalar_prefetch=0,
                grid=grid,
                in_specs=[
                    _adj_block_spec(tm, tk),                          # adj tile
                    pl.BlockSpec((tk, tn), lambda i, j, k: (k, j)),   # x tile
                ],
                out_specs=pl.BlockSpec((tm, tn), lambda i, j, k: (i, j)),
                scratch_shapes=scratch_shapes,
            ),
            compiler_params=pltpu.CompilerParams(
                dimension_semantics=("parallel", "parallel", "arbitrary"),
                vmem_limit_bytes=vmem_limit,
            ),
            cost_estimate=cost,
        )

        # Cast + pad the adjacency ONCE (cached across all ODE steps).
        adj_p = jnp.asarray(adj, compute_dtype)
        if (Np, Kp) != (N, K):
            adj_p = jnp.pad(adj_p, ((0, Np - N), (0, Kp - K)))
        self._adj_prepared = adj_p

        def fwd(a_p, x):
            xx = x.astype(compute_dtype)
            if (Kp, Dp) != (K, D):
                xx = jnp.pad(xx, ((0, Kp - K), (0, Dp - D)))
            out_p = call(a_p, xx)
            if (Np, Dp) != (N, D):
                out_p = out_p[:N, :D]
            return out_p

        self._forward = jax.jit(fwd)

    def __call__(self, t, x):
        """Matches ODEFunction.forward(t, x): t is unused (non-time-dependent)."""
        del t
        assert x.shape == (self._K, self._D)
        return self._forward(self._adj_prepared, x)


# ---------------------------------------------------------------------------
# Synthetic graph (deterministic) — LightGCN's normalized adj_t
# ---------------------------------------------------------------------------

def build_normalized_adjacency(key, n_nodes, edge_prob=0.05, dtype=jnp.float32):
    raw = jax.random.uniform(key, (n_nodes, n_nodes))
    a = (raw < edge_prob).astype(dtype)
    a = jnp.maximum(a, a.T)                        # symmetric
    a = a * (1.0 - jnp.eye(n_nodes, dtype=dtype))  # no self loops
    deg = jnp.sum(a, axis=1)
    d_inv_sqrt = jnp.where(deg > 0, 1.0 / jnp.sqrt(deg), 0.0)
    return (a * d_inv_sqrt[:, None]) * d_inv_sqrt[None, :]


if __name__ == "__main__":
    key = jax.random.PRNGKey(0)
    k_adj, k_x = jax.random.split(key)

    N = 256   # number of graph nodes (users + items)
    D = 128   # embedding dimension

    adj = build_normalized_adjacency(k_adj, N)                 # (N, N)
    x = jax.random.normal(k_x, (N, D), dtype=jnp.float32)      # (N, D)
    ref = adj @ x

    # f32-compute, gridless small path (exact).
    ode_f32 = ODEFunctionPallas(adj, D, compute_dtype=jnp.float32)
    out = jax.block_until_ready(ode_f32(0.0, x))
    assert out.shape == (N, D)
    assert jnp.allclose(out, ref, atol=1e-4, rtol=1e-4)

    # f32-compute, forced tiled path (exact).
    ode_f32_t = ODEFunctionPallas(adj, D, compute_dtype=jnp.float32,
                                  force_tiled=True)
    out_t = jax.block_until_ready(ode_f32_t(0.0, x))
    assert out_t.shape == (N, D)
    assert jnp.allclose(out_t, ref, atol=1e-4, rtol=1e-4)

    # Default bf16-compute (HBM-bound adjacency stream halved), both paths.
    ode_bf16 = ODEFunctionPallas(adj, D)
    out_b = jax.block_until_ready(ode_bf16(0.0, x))
    assert out_b.shape == (N, D)
    assert jnp.allclose(out_b, ref, atol=5e-2, rtol=5e-2)

    ode_bf16_t = ODEFunctionPallas(adj, D, force_tiled=True)
    out_bt = jax.block_until_ready(ode_bf16_t(0.0, x))
    assert out_bt.shape == (N, D)
    assert jnp.allclose(out_bt, ref, atol=5e-2, rtol=5e-2)

    print("KERNEL_OK")
</pallas_src>

<mosaic_0001>
module attributes {stable_mosaic.version = 11 : i64} {
  func.func @_lgconv_single_block_kernel(%arg0: memref<256x256xf32, #tpu.memory_space<vmem>>, %arg1: memref<256x128xf32, #tpu.memory_space<vmem>>, %arg2: memref<256x128xf32, #tpu.memory_space<vmem>>) attributes {dimension_semantics = [], scalar_prefetch = 0 : i64, scratch_operands = 0 : i64, tpu.core_type = #tpu.core_type<tc>} {
    %c0 = arith.constant 0 : index
    %c0_0 = arith.constant 0 : index
    %0 = vector.load %arg0[%c0, %c0_0] : memref<256x256xf32, #tpu.memory_space<vmem>>, vector<256x256xf32>
    %c0_1 = arith.constant 0 : index
    %c0_2 = arith.constant 0 : index
    %1 = vector.load %arg1[%c0_1, %c0_2] : memref<256x128xf32, #tpu.memory_space<vmem>>, vector<256x128xf32>
    %cst = arith.constant dense<0.000000e+00> : vector<256x128xf32>
    %2 = tpu.matmul %0, %1, %cst {dimension_numbers = #tpu.dot_dimension_numbers<[1], [0], [0], [1], [0, 0, 1, 1], [], []>} : vector<256x256xf32>, vector<256x128xf32>, vector<256x128xf32> -> vector<256x128xf32>
    %c0_3 = arith.constant 0 : index
    %c0_4 = arith.constant 0 : index
    %3 = vector.load %arg2[%c0_3, %c0_4] : memref<256x128xf32, #tpu.memory_space<vmem>>, vector<256x128xf32>
    tpu.vector_store %arg2[%c0_3, %c0_4], %2 {strides = array<i32>} : memref<256x128xf32, #tpu.memory_space<vmem>>, vector<256x128xf32>,
    return
  }
}

</mosaic_0001>

<bundles_post_ra>
// kernel: fwd.1
= control target key start
LH: loop header
LB: loop body
LE: loop exit
PB: predicated region body
PF: predicated region fallthrough
CT: control target
= control target key end

     0   :  { %7 = vsyncpa [#allocation3], 0  ;;  %s572_s0 = inlined_call_operand.hbm [shape: f32[256,256], index: 0, kind: input, shape index: {}]   ;;  %s573_s1 = inlined_call_operand.hbm [shape: f32[256,128], index: 1, kind: input, shape index: {}]   ;;  %s574_s2 = inlined_call_operand.hbm [shape: f32[256,128], index: 2, kind: output, shape index: {}]  }
   0x1   :  { %8 = vsyncpa [#allocation6], 0 }
   0x2   :  { %9 = vsyncpa [#allocation4], 0  ;;  %s14_s11 = sshll.u32 %s572_s0, 4  ;;  %s535_s12 = smov [#allocation2]   ;;  %s15_s11 = int_to_ptr.hbm [resolvable:$true] %s14_s11 }
   0x3   :  { %s16_s13 = sshll.u32 %s535_s12, 4  ;;  %s27_s16 = sshll.u32 %s573_s1, 4  ;;  %s17_s13 = int_to_ptr.vmem [resolvable:$true] %s16_s13  ;;  %s28_s16 = int_to_ptr.hbm [resolvable:$true] %s27_s16 }
   0x4   :  { %s536_s17 = smov 256   ;;  %s537_s18 = smov 16  }
   0x5   :  { %22 = dma.hbm_to_vmem [thread:$0]  %s15_s11, 8192, %s17_s13, [#allocation3], %s536_s17, %s536_s17, %s537_s18  }
   0x6   :  { %s538_s19 = smov [#allocation5]   ;;  %s539_s21 = smov 128  }
   0x7   :  { %s29_s20 = sshll.u32 %s538_s19, 4  ;;  %s540_s22 = smov 8   ;;  %s30_s20 = int_to_ptr.vmem [resolvable:$true] %s29_s20 }
   0x8   :  { %35 = dma.hbm_to_vmem [thread:$0]  %s28_s16, 4096, %s30_s20, [#allocation6], %s539_s21, %s539_s21, %s540_s22  }
   0x9   :  { %529 = dma.done.wait [#allocation3], 8192  }
   0xa   :  { %530 = vsyncadd [#allocation3], 4294959104 }
   0xb   :  { %531 = dma.done.wait [#allocation6], 4096  }
   0xc   :  { %532 = vsyncadd [#allocation6], 4294963200  ;;  %v123_v0 = vld [vmem:[#allocation5 + $0x78] sm:$0xff]  ;;  %v122_v2 = vld [vmem:[#allocation5 + $0x70] sm:$0xff]  ;;  %s541_s0 = smov [#allocation7]   ;;  %s404_s25 = sshll.u32 %s574_s2, 4  ;;  %s405_s25 = int_to_ptr.hbm [resolvable:$true] %s404_s25 }
   0xd   :  { %v139_v1 = vld [vmem:[#allocation5 + $0xf8] sm:$0xff]  ;;  %418 = vmatpush.msra.mxu2 %v123_v0  ;;  %v138_v3 = vld [vmem:[#allocation5 + $0xf0] sm:$0xff]  ;;  %v121_v4 = vld [vmem:[#allocation5 + $0x68] sm:$0xff]  ;;  %140 = vmatpush.msra.mxu0 %v123_v0  ;;  %s402_s1 = sshll.u32 %s541_s0, 4  ;;  %s403_s1 = int_to_ptr.vmem [resolvable:$true] %s402_s1 }
   0xe   :  { %434 = vmatpush.msra.mxu3 %v139_v1  ;;  %v137_v5 = vld [vmem:[#allocation5 + $0xe8] sm:$0xff]  ;;  %253 = vmatpush.msra.mxu1 %v139_v1  ;;  %v120_v6 = vld [vmem:[#allocation5 + $0x60] sm:$0xff]  ;;  %v119_v8 = vld [vmem:[#allocation5 + $0x58] sm:$0xff] }
   0xf   :  { %419 = vmatpush.msra.mxu2 %v122_v2  ;;  %v136_v7 = vld [vmem:[#allocation5 + $0xe0] sm:$0xff]  ;;  %141 = vmatpush.msra.mxu0 %v122_v2  ;;  %v135_v9 = vld [vmem:[#allocation5 + $0xd8] sm:$0xff]  ;;  %v118_v10 = vld [vmem:[#allocation5 + $0x50] sm:$0xff] }
  0x10   :  { %435 = vmatpush.msra.mxu3 %v138_v3  ;;  %254 = vmatpush.msra.mxu1 %v138_v3  ;;  %v134_v11 = vld [vmem:[#allocation5 + $0xd0] sm:$0xff]  ;;  %v117_v12 = vld [vmem:[#allocation5 + $0x48] sm:$0xff]  ;;  %v116_v14 = vld [vmem:[#allocation5 + $0x40] sm:$0xff] }
  0x11   :  { %420 = vmatpush.msra.mxu2 %v121_v4  ;;  %142 = vmatpush.msra.mxu0 %v121_v4  ;;  %v133_v13 = vld [vmem:[#allocation5 + $0xc8] sm:$0xff]  ;;  %v132_v15 = vld [vmem:[#allocation5 + $0xc0] sm:$0xff]  ;;  %v115_v16 = vld [vmem:[#allocation5 + $0x38] sm:$0xff] }
  0x12   :  { %436 = vmatpush.msra.mxu3 %v137_v5  ;;  %255 = vmatpush.msra.mxu1 %v137_v5  ;;  %v131_v17 = vld [vmem:[#allocation5 + $0xb8] sm:$0xff]  ;;  %v114_v18 = vld [vmem:[#allocation5 + $0x30] sm:$0xff]  ;;  %v113_v20 = vld [vmem:[#allocation5 + $0x28] sm:$0xff] }
  0x13   :  { %421 = vmatpush.msra.mxu2 %v120_v6  ;;  %143 = vmatpush.msra.mxu0 %v120_v6  ;;  %v130_v19 = vld [vmem:[#allocation5 + $0xb0] sm:$0xff]  ;;  %v129_v21 = vld [vmem:[#allocation5 + $0xa8] sm:$0xff]  ;;  %v112_v22 = vld [vmem:[#allocation5 + $0x20] sm:$0xff] }
  0x14   :  { %437 = vmatpush.msra.mxu3 %v136_v7  ;;  %256 = vmatpush.msra.mxu1 %v136_v7  ;;  %v128_v23 = vld [vmem:[#allocation5 + $0xa0] sm:$0xff]  ;;  %v111_v24 = vld [vmem:[#allocation5 + $0x18] sm:$0xff]  ;;  %v110_v26 = vld [vmem:[#allocation5 + $0x10] sm:$0xff] }
  0x15   :  { %422 = vmatpush.msra.mxu2 %v119_v8  ;;  %144 = vmatpush.msra.mxu0 %v119_v8  ;;  %v127_v25 = vld [vmem:[#allocation5 + $0x98] sm:$0xff]  ;;  %v126_v27 = vld [vmem:[#allocation5 + $0x90] sm:$0xff]  ;;  %v109_v28 = vld [vmem:[#allocation5 + $0x8] sm:$0xff] }
  0x16   :  { %438 = vmatpush.msra.mxu3 %v135_v9  ;;  %257 = vmatpush.msra.mxu1 %v135_v9  ;;  %v125_v29 = vld [vmem:[#allocation5 + $0x88] sm:$0xff]  ;;  %v108_v30 = vld [vmem:[#allocation5] sm:$0xff]  ;;  %v78_v36 = vld [vmem:[#allocation2 + $0x110] sm:$0xff] }
  0x17   :  { %423 = vmatpush.msra.mxu2 %v118_v10  ;;  %145 = vmatpush.msra.mxu0 %v118_v10  ;;  %v124_v31 = vld [vmem:[#allocation5 + $0x80] sm:$0xff]  ;;  %v77_v33 = vld [vmem:[#allocation2 + $0x108] sm:$0xff]  ;;  %v79_v37 = vld [vmem:[#allocation2 + $0x118] sm:$0xff] }
  0x18   :  { %439 = vmatpush.msra.mxu3 %v134_v11  ;;  %258 = vmatpush.msra.mxu1 %v134_v11  ;;  %v76_v32 = vld [vmem:[#allocation2 + $0x100] sm:$0xff]  ;;  %v45_v35 = vld [vmem:[#allocation2 + $0x8] sm:$0xff]  ;;  %v46_v38 = vld [vmem:[#allocation2 + $0x10] sm:$0xff] }
  0x19   :  { %424 = vmatpush.msra.mxu2 %v117_v12  ;;  %146 = vmatpush.msra.mxu0 %v117_v12  ;;  %v44_v34 = vld [vmem:[#allocation2] sm:$0xff]  ;;  %v47_v39 = vld [vmem:[#allocation2 + $0x18] sm:$0xff]  ;;  %v81_v41 = vld [vmem:[#allocation2 + $0x128] sm:$0xff] }
  0x1a   :  { %440 = vmatpush.msra.mxu3 %v133_v13  ;;  %259 = vmatpush.msra.mxu1 %v133_v13  ;;  %v80_v40 = vld [vmem:[#allocation2 + $0x120] sm:$0xff]  ;;  %v49_v43 = vld [vmem:[#allocation2 + $0x28] sm:$0xff]  ;;  %v82_v44 = vld [vmem:[#allocation2 + $0x130] sm:$0xff] }
  0x1b   :  { %425 = vmatpush.msra.mxu2 %v116_v14  ;;  %147 = vmatpush.msra.mxu0 %v116_v14  ;;  %v48_v42 = vld [vmem:[#allocation2 + $0x20] sm:$0xff]  ;;  %v83_v45 = vld [vmem:[#allocation2 + $0x138] sm:$0xff]  ;;  %v50_v46 = vld [vmem:[#allocation2 + $0x30] sm:$0xff] }
  0x1c   :  { %441 = vmatpush.msra.mxu3 %v132_v15  ;;  %260 = vmatpush.msra.mxu1 %v132_v15  ;;  %v51_v47 = vld [vmem:[#allocation2 + $0x38] sm:$0xff]  ;;  %v84_v48 = vld [vmem:[#allocation2 + $0x140] sm:$0xff]  ;;  %v85_v49 = vld [vmem:[#allocation2 + $0x148] sm:$0xff] }
  0x1d   :  { %426 = vmatpush.msra.mxu2 %v115_v16  ;;  %148 = vmatpush.msra.mxu0 %v115_v16  ;;  %v52_v50 = vld [vmem:[#allocation2 + $0x40] sm:$0xff]  ;;  %v53_v51 = vld [vmem:[#allocation2 + $0x48] sm:$0xff]  ;;  %v86_v52 = vld [vmem:[#allocation2 + $0x150] sm:$0xff] }
  0x1e   :  { %442 = vmatpush.msra.mxu3 %v131_v17  ;;  %261 = vmatpush.msra.mxu1 %v131_v17  ;;  %v87_v53 = vld [vmem:[#allocation2 + $0x158] sm:$0xff]  ;;  %v54_v54 = vld [vmem:[#allocation2 + $0x50] sm:$0xff]  ;;  %v88_v56 = vld [vmem:[#allocation2 + $0x160] sm:$0xff] }
  0x1f   :  { %427 = vmatpush.msra.mxu2 %v114_v18  ;;  %149 = vmatpush.msra.mxu0 %v114_v18  ;;  %v55_v55 = vld [vmem:[#allocation2 + $0x58] sm:$0xff]  ;;  %v89_v57 = vld [vmem:[#allocation2 + $0x168] sm:$0xff]  ;;  %v56_v58 = vld [vmem:[#allocation2 + $0x60] sm:$0xff] }
  0x20   :  { %443 = vmatpush.msra.mxu3 %v130_v19  ;;  %262 = vmatpush.msra.mxu1 %v130_v19  ;;  %v57_v59 = vld [vmem:[#allocation2 + $0x68] sm:$0xff]  ;;  %v90_v60 = vld [vmem:[#allocation2 + $0x170] sm:$0xff]  ;;  %v91_v61 = vld [vmem:[#allocation2 + $0x178] sm:$0xff] }
  0x21   :  { %428 = vmatpush.msra.mxu2 %v113_v20  ;;  %150 = vmatpush.msra.mxu0 %v113_v20  ;;  %v58_v62 = vld [vmem:[#allocation2 + $0x70] sm:$0xff]  ;;  %v59_v63 = vld [vmem:[#allocation2 + $0x78] sm:$0xff]  ;;  %v92_v0 = vld [vmem:[#allocation2 + $0x180] sm:$0xff] }
  0x22   :  { %444 = vmatpush.msra.mxu3 %v129_v21  ;;  %263 = vmatpush.msra.mxu1 %v129_v21  ;;  %v93_v1 = vld [vmem:[#allocation2 + $0x188] sm:$0xff]  ;;  %v60_v2 = vld [vmem:[#allocation2 + $0x80] sm:$0xff]  ;;  %v94_v4 = vld [vmem:[#allocation2 + $0x190] sm:$0xff] }
  0x23   :  { %429 = vmatpush.msra.mxu2 %v112_v22  ;;  %151 = vmatpush.msra.mxu0 %v112_v22  ;;  %v61_v3 = vld [vmem:[#allocation2 + $0x88] sm:$0xff]  ;;  %v95_v5 = vld [vmem:[#allocation2 + $0x198] sm:$0xff]  ;;  %v62_v6 = vld [vmem:[#allocation2 + $0x90] sm:$0xff] }
  0x24   :  { %445 = vmatpush.msra.mxu3 %v128_v23  ;;  %264 = vmatpush.msra.mxu1 %v128_v23  ;;  %v63_v7 = vld [vmem:[#allocation2 + $0x98] sm:$0xff]  ;;  %v96_v8 = vld [vmem:[#allocation2 + $0x1a0] sm:$0xff]  ;;  %v97_v9 = vld [vmem:[#allocation2 + $0x1a8] sm:$0xff] }
  0x25   :  { %430 = vmatpush.msra.mxu2 %v111_v24  ;;  %152 = vmatpush.msra.mxu0 %v111_v24  ;;  %v64_v10 = vld [vmem:[#allocation2 + $0xa0] sm:$0xff]  ;;  %v65_v11 = vld [vmem:[#allocation2 + $0xa8] sm:$0xff]  ;;  %v98_v12 = vld [vmem:[#allocation2 + $0x1b0] sm:$0xff] }
  0x26   :  { %446 = vmatpush.msra.mxu3 %v127_v25  ;;  %265 = vmatpush.msra.mxu1 %v127_v25  ;;  %v99_v13 = vld [vmem:[#allocation2 + $0x1b8] sm:$0xff]  ;;  %v66_v14 = vld [vmem:[#allocation2 + $0xb0] sm:$0xff]  ;;  %v100_v16 = vld [vmem:[#allocation2 + $0x1c0] sm:$0xff] }
  0x27   :  { %431 = vmatpush.msra.mxu2 %v110_v26  ;;  %153 = vmatpush.msra.mxu0 %v110_v26  ;;  %v67_v15 = vld [vmem:[#allocation2 + $0xb8] sm:$0xff]  ;;  %v101_v17 = vld [vmem:[#allocation2 + $0x1c8] sm:$0xff]  ;;  %v68_v18 = vld [vmem:[#allocation2 + $0xc0] sm:$0xff] }
  0x28   :  { %447 = vmatpush.msra.mxu3 %v126_v27  ;;  %266 = vmatpush.msra.mxu1 %v126_v27  ;;  %v69_v19 = vld [vmem:[#allocation2 + $0xc8] sm:$0xff]  ;;  %v102_v20 = vld [vmem:[#allocation2 + $0x1d0] sm:$0xff]  ;;  %v103_v21 = vld [vmem:[#allocation2 + $0x1d8] sm:$0xff] }
  0x29   :  { %432 = vmatpush.msra.mxu2 %v109_v28  ;;  %154 = vmatpush.msra.mxu0 %v109_v28  ;;  %v70_v22 = vld [vmem:[#allocation2 + $0xd0] sm:$0xff]  ;;  %v71_v23 = vld [vmem:[#allocation2 + $0xd8] sm:$0xff]  ;;  %v104_v24 = vld [vmem:[#allocation2 + $0x1e0] sm:$0xff] }
  0x2a   :  { %448 = vmatpush.msra.mxu3 %v125_v29  ;;  %267 = vmatpush.msra.mxu1 %v125_v29  ;;  %v105_v25 = vld [vmem:[#allocation2 + $0x1e8] sm:$0xff]  ;;  %v72_v26 = vld [vmem:[#allocation2 + $0xe0] sm:$0xff]  ;;  %v106_v28 = vld [vmem:[#allocation2 + $0x1f0] sm:$0xff] }
  0x2b   :  { %433 = vmatpush.msra.mxu2 %v108_v30  ;;  %155 = vmatpush.msra.mxu0 %v108_v30  ;;  %v73_v27 = vld [vmem:[#allocation2 + $0xe8] sm:$0xff]  ;;  %v107_v29 = vld [vmem:[#allocation2 + $0x1f8] sm:$0xff]  ;;  %v74_v30 = vld [vmem:[#allocation2 + $0xf0] sm:$0xff] }
  0x2c   :  { %449 = vmatpush.msra.mxu3 %v124_v31  ;;  %204 = vmatmul.f32.vlgmr.msra.gmra.mxu2 %v76_v32 }
  0x2d   :  { %317 = vmatmul.f32.vlgmr.msra.gmra.mxu3 %v77_v33  ;;  %268 = vmatpush.msra.mxu1 %v124_v31  ;;  %v75_v31 = vld [vmem:[#allocation2 + $0xf8] sm:$0xff] }
  0x2e   :  { %156 = vmatmul.f32.vlgmr.msra.gmra.mxu0 %v44_v34  ;;  %269 = vmatmul.f32.vlgmr.msra.gmra.mxu1 %v45_v35 }
  0x34   :  { %207 = vmatmul.f32.gmra.mxu2 %v78_v36 }
  0x35   :  { %320 = vmatmul.f32.gmra.mxu3 %v79_v37 }
  0x36   :  { %159 = vmatmul.f32.gmra.mxu0 %v46_v38  ;;  %272 = vmatmul.f32.gmra.mxu1 %v47_v39 }
  0x3c   :  { %210 = vmatmul.f32.gmra.mxu2 %v80_v40 }
  0x3d   :  { %323 = vmatmul.f32.gmra.mxu3 %v81_v41 }
  0x3e   :  { %162 = vmatmul.f32.gmra.mxu0 %v48_v42  ;;  %275 = vmatmul.f32.gmra.mxu1 %v49_v43 }
  0x44   :  { %213 = vmatmul.f32.gmra.mxu2 %v82_v44 }
  0x45   :  { %326 = vmatmul.f32.gmra.mxu3 %v83_v45 }
  0x46   :  { %165 = vmatmul.f32.gmra.mxu0 %v50_v46  ;;  %278 = vmatmul.f32.gmra.mxu1 %v51_v47 }
  0x4c   :  { %216 = vmatmul.f32.gmra.mxu2 %v84_v48 }
  0x4d   :  { %329 = vmatmul.f32.gmra.mxu3 %v85_v49 }
  0x4e   :  { %168 = vmatmul.f32.gmra.mxu0 %v52_v50  ;;  %281 = vmatmul.f32.gmra.mxu1 %v53_v51 }
  0x54   :  { %219 = vmatmul.f32.gmra.mxu2 %v86_v52 }
  0x55   :  { %332 = vmatmul.f32.gmra.mxu3 %v87_v53 }
  0x56   :  { %171 = vmatmul.f32.gmra.mxu0 %v54_v54  ;;  %284 = vmatmul.f32.gmra.mxu1 %v55_v55 }
  0x5c   :  { %222 = vmatmul.f32.gmra.mxu2 %v88_v56 }
  0x5d   :  { %335 = vmatmul.f32.gmra.mxu3 %v89_v57 }
  0x5e   :  { %174 = vmatmul.f32.gmra.mxu0 %v56_v58  ;;  %287 = vmatmul.f32.gmra.mxu1 %v57_v59 }
  0x64   :  { %225 = vmatmul.f32.gmra.mxu2 %v90_v60 }
  0x65   :  { %338 = vmatmul.f32.gmra.mxu3 %v91_v61 }
  0x66   :  { %177 = vmatmul.f32.gmra.mxu0 %v58_v62  ;;  %290 = vmatmul.f32.gmra.mxu1 %v59_v63 }
  0x6c   :  { %228 = vmatmul.f32.gmra.mxu2 %v92_v0 }
  0x6d   :  { %341 = vmatmul.f32.gmra.mxu3 %v93_v1 }
  0x6e   :  { %180 = vmatmul.f32.gmra.mxu0 %v60_v2  ;;  %293 = vmatmul.f32.gmra.mxu1 %v61_v3 }
  0x74   :  { %231 = vmatmul.f32.gmra.mxu2 %v94_v4 }
  0x75   :  { %344 = vmatmul.f32.gmra.mxu3 %v95_v5 }
  0x76   :  { %183 = vmatmul.f32.gmra.mxu0 %v62_v6  ;;  %296 = vmatmul.f32.gmra.mxu1 %v63_v7 }
  0x7c   :  { %234 = vmatmul.f32.gmra.mxu2 %v96_v8 }
  0x7d   :  { %347 = vmatmul.f32.gmra.mxu3 %v97_v9 }
  0x7e   :  { %186 = vmatmul.f32.gmra.mxu0 %v64_v10  ;;  %299 = vmatmul.f32.gmra.mxu1 %v65_v11 }
  0x84   :  { %237 = vmatmul.f32.gmra.mxu2 %v98_v12 }
  0x85   :  { %350 = vmatmul.f32.gmra.mxu3 %v99_v13 }
  0x86   :  { %189 = vmatmul.f32.gmra.mxu0 %v66_v14  ;;  %302 = vmatmul.f32.gmra.mxu1 %v67_v15 }
  0x8c   :  { %240 = vmatmul.f32.gmra.mxu2 %v100_v16 }
  0x8d   :  { %353 = vmatmul.f32.gmra.mxu3 %v101_v17 }
  0x8e   :  { %192 = vmatmul.f32.gmra.mxu0 %v68_v18  ;;  %305 = vmatmul.f32.gmra.mxu1 %v69_v19 }
  0x94   :  { %243 = vmatmul.f32.gmra.mxu2 %v102_v20 }
  0x95   :  { %356 = vmatmul.f32.gmra.mxu3 %v103_v21 }
  0x96   :  { %195 = vmatmul.f32.gmra.mxu0 %v70_v22  ;;  %308 = vmatmul.f32.gmra.mxu1 %v71_v23 }
  0x9c   :  { %246 = vmatmul.f32.gmra.mxu2 %v104_v24 }
  0x9d   :  { %359 = vmatmul.f32.gmra.mxu3 %v105_v25 }
  0x9e   :  { %198 = vmatmul.f32.gmra.mxu0 %v72_v26  ;;  %311 = vmatmul.f32.gmra.mxu1 %v73_v27 }
  0xa4   :  { %249 = vmatmul.f32.gmra.mxu2 %v106_v28 }
  0xa5   :  { %362 = vmatmul.f32.gmra.mxu3 %v107_v29 }
  0xa6   :  { %201 = vmatmul.f32.gmra.mxu0 %v74_v30  ;;  %314 = vmatmul.f32.gmra.mxu1 %v75_v31 }
  0xab   :  { %v157_v32 = vpop.f32.mrf.mxu0  ;;  %v270_v33 = vpop.f32.mrf.mxu1 }
  0xac   :  { %v271_v34 = vadd.f32 %v270_v33, %v157_v32 }
  0xae   :  { %366 = vst [vmem:[#allocation7] sm:$0xff] %v271_v34 }
  0xaf   :  { %v205_v35 = vpop.f32.mrf.mxu2 }
  0xb0   :  { %v318_v36 = vpop.f32.mrf.mxu3 }
  0xb1   :  { %v319_v37 = vadd.f32 %v318_v36, %v205_v35 }
  0xb3   :  { %382 = vst [vmem:[#allocation7 + $0x80] sm:$0xff] %v319_v37  ;;  %v160_v38 = vpop.f32.mrf.mxu0  ;;  %v273_v39 = vpop.f32.mrf.mxu1 }
  0xb4   :  { %v274_v40 = vadd.f32 %v273_v39, %v160_v38 }
  0xb6   :  { %367 = vst [vmem:[#allocation7 + $0x8] sm:$0xff] %v274_v40 }
  0xb7   :  { %v208_v41 = vpop.f32.mrf.mxu2 }
  0xb8   :  { %v321_v42 = vpop.f32.mrf.mxu3 }
  0xb9   :  { %v322_v43 = vadd.f32 %v321_v42, %v208_v41 }
  0xbb   :  { %383 = vst [vmem:[#allocation7 + $0x88] sm:$0xff] %v322_v43  ;;  %v163_v44 = vpop.f32.mrf.mxu0  ;;  %v276_v45 = vpop.f32.mrf.mxu1 }
  0xbc   :  { %v277_v46 = vadd.f32 %v276_v45, %v163_v44 }
  0xbe   :  { %368 = vst [vmem:[#allocation7 + $0x10] sm:$0xff] %v277_v46 }
  0xbf   :  { %v211_v47 = vpop.f32.mrf.mxu2 }
  0xc0   :  { %v324_v48 = vpop.f32.mrf.mxu3 }
  0xc1   :  { %v325_v49 = vadd.f32 %v324_v48, %v211_v47 }
  0xc3   :  { %384 = vst [vmem:[#allocation7 + $0x90] sm:$0xff] %v325_v49  ;;  %v166_v50 = vpop.f32.mrf.mxu0  ;;  %v279_v51 = vpop.f32.mrf.mxu1 }
  0xc4   :  { %v280_v52 = vadd.f32 %v279_v51, %v166_v50 }
  0xc6   :  { %369 = vst [vmem:[#allocation7 + $0x18] sm:$0xff] %v280_v52 }
  0xc7   :  { %v214_v53 = vpop.f32.mrf.mxu2 }
  0xc8   :  { %v327_v54 = vpop.f32.mrf.mxu3 }
  0xc9   :  { %v328_v55 = vadd.f32 %v327_v54, %v214_v53 }
  0xcb   :  { %385 = vst [vmem:[#allocation7 + $0x98] sm:$0xff] %v328_v55  ;;  %v169_v56 = vpop.f32.mrf.mxu0  ;;  %v282_v57 = vpop.f32.mrf.mxu1 }
  0xcc   :  { %v283_v58 = vadd.f32 %v282_v57, %v169_v56 }
  0xce   :  { %370 = vst [vmem:[#allocation7 + $0x20] sm:$0xff] %v283_v58 }
  0xcf   :  { %v217_v59 = vpop.f32.mrf.mxu2 }
  0xd0   :  { %v330_v60 = vpop.f32.mrf.mxu3 }
  0xd1   :  { %v331_v61 = vadd.f32 %v330_v60, %v217_v59 }
  0xd3   :  { %386 = vst [vmem:[#allocation7 + $0xa0] sm:$0xff] %v331_v61  ;;  %v172_v62 = vpop.f32.mrf.mxu0  ;;  %v285_v63 = vpop.f32.mrf.mxu1 }
  0xd4   :  { %v286_v0 = vadd.f32 %v285_v63, %v172_v62 }
  0xd6   :  { %371 = vst [vmem:[#allocation7 + $0x28] sm:$0xff] %v286_v0 }
  0xd7   :  { %v220_v1 = vpop.f32.mrf.mxu2 }
  0xd8   :  { %v333_v2 = vpop.f32.mrf.mxu3 }
  0xd9   :  { %v334_v3 = vadd.f32 %v333_v2, %v220_v1 }
  0xdb   :  { %387 = vst [vmem:[#allocation7 + $0xa8] sm:$0xff] %v334_v3  ;;  %v175_v4 = vpop.f32.mrf.mxu0  ;;  %v288_v5 = vpop.f32.mrf.mxu1 }
  0xdc   :  { %v289_v6 = vadd.f32 %v288_v5, %v175_v4 }
  0xde   :  { %372 = vst [vmem:[#allocation7 + $0x30] sm:$0xff] %v289_v6 }
  0xdf   :  { %v223_v7 = vpop.f32.mrf.mxu2 }
  0xe0   :  { %v336_v8 = vpop.f32.mrf.mxu3 }
  0xe1   :  { %v337_v9 = vadd.f32 %v336_v8, %v223_v7 }
  0xe3   :  { %388 = vst [vmem:[#allocation7 + $0xb0] sm:$0xff] %v337_v9  ;;  %v178_v10 = vpop.f32.mrf.mxu0  ;;  %v291_v11 = vpop.f32.mrf.mxu1 }
  0xe4   :  { %v292_v12 = vadd.f32 %v291_v11, %v178_v10 }
  0xe6   :  { %373 = vst [vmem:[#allocation7 + $0x38] sm:$0xff] %v292_v12 }
  0xe7   :  { %v226_v13 = vpop.f32.mrf.mxu2 }
  0xe8   :  { %v339_v14 = vpop.f32.mrf.mxu3 }
  0xe9   :  { %v340_v15 = vadd.f32 %v339_v14, %v226_v13 }
  0xeb   :  { %389 = vst [vmem:[#allocation7 + $0xb8] sm:$0xff] %v340_v15  ;;  %v181_v16 = vpop.f32.mrf.mxu0  ;;  %v294_v17 = vpop.f32.mrf.mxu1 }
  0xec   :  { %v295_v18 = vadd.f32 %v294_v17, %v181_v16 }
  0xee   :  { %374 = vst [vmem:[#allocation7 + $0x40] sm:$0xff] %v295_v18 }
  0xef   :  { %v229_v19 = vpop.f32.mrf.mxu2 }
  0xf0   :  { %v342_v20 = vpop.f32.mrf.mxu3 }
  0xf1   :  { %v343_v21 = vadd.f32 %v342_v20, %v229_v19 }
  0xf3   :  { %390 = vst [vmem:[#allocation7 + $0xc0] sm:$0xff] %v343_v21  ;;  %v184_v22 = vpop.f32.mrf.mxu0  ;;  %v297_v23 = vpop.f32.mrf.mxu1 }
  0xf4   :  { %v298_v24 = vadd.f32 %v297_v23, %v184_v22 }
  0xf6   :  { %375 = vst [vmem:[#allocation7 + $0x48] sm:$0xff] %v298_v24 }
  0xf7   :  { %v232_v25 = vpop.f32.mrf.mxu2 }
  0xf8   :  { %v345_v26 = vpop.f32.mrf.mxu3 }
  0xf9   :  { %v346_v27 = vadd.f32 %v345_v26, %v232_v25 }
  0xfb   :  { %391 = vst [vmem:[#allocation7 + $0xc8] sm:$0xff] %v346_v27  ;;  %v187_v28 = vpop.f32.mrf.mxu0  ;;  %v300_v29 = vpop.f32.mrf.mxu1 }
  0xfc   :  { %v301_v30 = vadd.f32 %v300_v29, %v187_v28 }
  0xfe   :  { %376 = vst [vmem:[#allocation7 + $0x50] sm:$0xff] %v301_v30 }
  0xff   :  { %v235_v31 = vpop.f32.mrf.mxu2 }
 0x100   :  { %v348_v32 = vpop.f32.mrf.mxu3 }
 0x101   :  { %v349_v33 = vadd.f32 %v348_v32, %v235_v31 }
 0x103   :  { %392 = vst [vmem:[#allocation7 + $0xd0] sm:$0xff] %v349_v33  ;;  %v190_v34 = vpop.f32.mrf.mxu0  ;;  %v303_v35 = vpop.f32.mrf.mxu1 }
 0x104   :  { %v304_v36 = vadd.f32 %v303_v35, %v190_v34 }
 0x106   :  { %377 = vst [vmem:[#allocation7 + $0x58] sm:$0xff] %v304_v36 }
 0x107   :  { %v238_v37 = vpop.f32.mrf.mxu2 }
 0x108   :  { %v351_v38 = vpop.f32.mrf.mxu3 }
 0x109   :  { %v352_v39 = vadd.f32 %v351_v38, %v238_v37 }
 0x10b   :  { %393 = vst [vmem:[#allocation7 + $0xd8] sm:$0xff] %v352_v39  ;;  %v193_v40 = vpop.f32.mrf.mxu0  ;;  %v306_v41 = vpop.f32.mrf.mxu1 }
 0x10c   :  { %v307_v42 = vadd.f32 %v306_v41, %v193_v40 }
 0x10e   :  { %378 = vst [vmem:[#allocation7 + $0x60] sm:$0xff] %v307_v42 }
 0x10f   :  { %v241_v43 = vpop.f32.mrf.mxu2 }
 0x110   :  { %v354_v44 = vpop.f32.mrf.mxu3 }
 0x111   :  { %v355_v45 = vadd.f32 %v354_v44, %v241_v43 }
 0x113   :  { %394 = vst [vmem:[#allocation7 + $0xe0] sm:$0xff] %v355_v45  ;;  %v196_v46 = vpop.f32.mrf.mxu0  ;;  %v309_v47 = vpop.f32.mrf.mxu1 }
 0x114   :  { %v310_v48 = vadd.f32 %v309_v47, %v196_v46 }
 0x116   :  { %379 = vst [vmem:[#allocation7 + $0x68] sm:$0xff] %v310_v48 }
 0x117   :  { %v244_v49 = vpop.f32.mrf.mxu2 }
 0x118   :  { %v357_v50 = vpop.f32.mrf.mxu3 }
 0x119   :  { %v358_v51 = vadd.f32 %v357_v50, %v244_v49 }
 0x11b   :  { %395 = vst [vmem:[#allocation7 + $0xe8] sm:$0xff] %v358_v51  ;;  %v199_v52 = vpop.f32.mrf.mxu0  ;;  %v312_v53 = vpop.f32.mrf.mxu1 }
 0x11c   :  { %v313_v54 = vadd.f32 %v312_v53, %v199_v52 }
 0x11e   :  { %380 = vst [vmem:[#allocation7 + $0x70] sm:$0xff] %v313_v54 }
 0x11f   :  { %v247_v55 = vpop.f32.mrf.mxu2 }
 0x120   :  { %v360_v56 = vpop.f32.mrf.mxu3 }
 0x121   :  { %v361_v57 = vadd.f32 %v360_v56, %v247_v55 }
 0x123   :  { %396 = vst [vmem:[#allocation7 + $0xf0] sm:$0xff] %v361_v57  ;;  %v202_v58 = vpop.f32.mrf.mxu0  ;;  %v315_v59 = vpop.f32.mrf.mxu1 }
 0x124   :  { %v316_v60 = vadd.f32 %v315_v59, %v202_v58 }
 0x126   :  { %381 = vst [vmem:[#allocation7 + $0x78] sm:$0xff] %v316_v60 }
 0x127   :  { %v250_v61 = vpop.f32.mrf.mxu2 }
 0x128   :  { %v363_v62 = vpop.f32.mrf.mxu3 }
 0x129   :  { %v364_v63 = vadd.f32 %v363_v62, %v250_v61 }
 0x12b   :  { %397 = vst [vmem:[#allocation7 + $0xf8] sm:$0xff] %v364_v63 }
 0x12c   :  { %410 = dma.vmem_to_hbm [thread:$0]  %s403_s1, 4096, %s405_s25, [#allocation4], %s539_s21, %s539_s21, %s540_s22  }
 0x12d   :  { %533 = dma.done.wait [#allocation4], 4096  }
 0x12e   :  { %534 = vsyncadd [#allocation4], 4294963200 }
 0x12f   :  { %415 = vsyncpa [#allocation3], 1 }
 0x130   :  { %416 = vsyncpa [#allocation6], 1 }
 0x131   :  { %417 = vsyncpa [#allocation4], 1 }

</bundles_post_ra>
